<compile_context>
chip_gen: v6e
topology: v6e:2x2x1
jax: 0.10.0
libtpu: 0.0.40
codegen_flags: <defaults>
</compile_context>

<pallas_src>
import functools

import numpy as np
import jax
import jax.numpy as jnp
from jax.experimental import pallas as pl
from jax.experimental.pallas import tpu as pltpu

_LANES = 128


def _pick_tile_rows(r, max_rows=2048):
    """Largest row-tile that divides r, is <= max_rows and keeps (8,128) tiling."""
    if r <= max_rows:
        return r
    start = max_rows - (max_rows % 8)
    for t in range(start, 7, -8):              # multiples of 8, descending
        if r % t == 0:
            return t
    # TODO(synk): pathological R with no multiple-of-8 divisor <= max_rows;
    # fall back to one big block (correct, but VMEM-heavy).
    return r


# ----------------------------- Pallas kernels ------------------------------

def _quantile_kernel(q_smem, pred_ref, true_ref, mask_ref,
                     psum_ref, asum_ref, acc_ref, macc_ref, *, mid):
    """Streams one (tile_r, 128) slab per step; accumulates pinball sums per
    quantile and the MAE sum (median quantile only) in VMEM scratch."""
    b = pl.program_id(0)
    k = pl.program_id(1)
    i = pl.program_id(2)
    nb = pl.num_programs(0)
    nk = pl.num_programs(1)

    first_bk = jnp.logical_and(b == 0, k == 0)
    last_bk = jnp.logical_and(b == nb - 1, k == nk - 1)

    @pl.when(first_bk)
    def _():
        acc_ref[i] = jnp.zeros_like(acc_ref[i])

    @pl.when(jnp.logical_and(first_bk, i == 0))
    def _():
        macc_ref[...] = jnp.zeros_like(macc_ref)

    m = mask_ref[...].astype(jnp.float32)
    t = true_ref[...].astype(jnp.float32)
    p = pred_ref[...].astype(jnp.float32) * m        # forward: pred * mask
    err = (p - t) * m                                # PinballLoss masking
    abs_err = jnp.abs(err)
    q = q_smem[b, i]                                 # scalar from SMEM
    coeff = jnp.where(err < 0.0, q, 1.0 - q)         # err==0 -> abs_err==0
    ploss = coeff * abs_err

    acc_ref[i] += jnp.sum(ploss, axis=0, keepdims=True)

    @pl.when(i == mid)
    def _():
        macc_ref[...] += jnp.sum(jnp.abs(p - t), axis=0, keepdims=True)

    @pl.when(last_bk)
    def _():
        psum_ref[i] = jnp.sum(acc_ref[i])

    @pl.when(jnp.logical_and(last_bk, i == mid))
    def _():
        asum_ref[0] = jnp.sum(macc_ref[...])


def _mis_kernel(toa_smem, lo_ref, up_ref, mid_ref, true_ref, mask_ref,
                msum_ref, maesum_ref, masksum_ref,
                acc_ref, maeacc_ref, maskacc_ref):
    """Per interval pair p: MIS-loss sum; also MAE sum and mask sum (p == 0)."""
    b = pl.program_id(0)
    k = pl.program_id(1)
    p = pl.program_id(2)
    nb = pl.num_programs(0)
    nk = pl.num_programs(1)

    first_bk = jnp.logical_and(b == 0, k == 0)
    last_bk = jnp.logical_and(b == nb - 1, k == nk - 1)

    @pl.when(first_bk)
    def _():
        acc_ref[p] = jnp.zeros_like(acc_ref[p])

    @pl.when(jnp.logical_and(first_bk, p == 0))
    def _():
        maeacc_ref[...] = jnp.zeros_like(maeacc_ref)
        maskacc_ref[...] = jnp.zeros_like(maskacc_ref)

    m = mask_ref[...].astype(jnp.float32)
    t = true_ref[...].astype(jnp.float32)
    lo = lo_ref[...].astype(jnp.float32) * m
    up = up_ref[...].astype(jnp.float32) * m
    toa = toa_smem[b, p]                             # 2 / alpha (> 0)
    # max(x, x + y) == x + relu(y)  (toa > 0 for valid quantiles)
    loss = (up - lo) + toa * (jnp.maximum(lo - t, 0.0) + jnp.maximum(t - up, 0.0))
    acc_ref[p] += jnp.sum(loss, axis=0, keepdims=True)

    @pl.when(p == 0)
    def _():
        mid_p = mid_ref[...].astype(jnp.float32) * m
        maeacc_ref[...] += jnp.sum(jnp.abs(mid_p - t), axis=0, keepdims=True)
        maskacc_ref[...] += jnp.sum(m, axis=0, keepdims=True)

    @pl.when(last_bk)
    def _():
        msum_ref[p] = jnp.sum(acc_ref[p])

    @pl.when(jnp.logical_and(last_bk, p == 0))
    def _():
        maesum_ref[0] = jnp.sum(maeacc_ref[...])
        masksum_ref[0] = jnp.sum(maskacc_ref[...])


# ------------------------------ pallas_call glue ----------------------------

def _quantile_sums(pred4, true3, mask3, quantiles_bq, mid, tile_r):
    B, Q, R, L = pred4.shape
    kt = R // tile_r
    smem_out = pl.BlockSpec(memory_space=pltpu.MemorySpace.SMEM)
    kernel = functools.partial(_quantile_kernel, mid=mid)
    return pl.pallas_call(
        kernel,
        out_shape=(jax.ShapeDtypeStruct((Q,), jnp.float32),
                   jax.ShapeDtypeStruct((1,), jnp.float32)),
        grid_spec=pltpu.PrefetchScalarGridSpec(
            num_scalar_prefetch=1,
            grid=(B, kt, Q),
            in_specs=[
                pl.BlockSpec((None, None, tile_r, L), lambda b, k, i, q: (b, i, k, 0)),
                pl.BlockSpec((None, tile_r, L), lambda b, k, i, q: (b, k, 0)),
                pl.BlockSpec((None, tile_r, L), lambda b, k, i, q: (b, k, 0)),
            ],
            out_specs=(smem_out, smem_out),
            scratch_shapes=[pltpu.VMEM((Q, 1, L), jnp.float32),
                            pltpu.VMEM((1, L), jnp.float32)],
        ),
        compiler_params=pltpu.CompilerParams(
            dimension_semantics=("arbitrary", "arbitrary", "arbitrary")),
    )(quantiles_bq, pred4, true3, mask3)


def _mis_sums(pred4, true3, mask3, toa_bp, mid, tile_r):
    B, Q, R, L = pred4.shape
    P = mid
    kt = R // tile_r
    smem_out = pl.BlockSpec(memory_space=pltpu.MemorySpace.SMEM)
    return pl.pallas_call(
        _mis_kernel,
        out_shape=(jax.ShapeDtypeStruct((P,), jnp.float32),
                   jax.ShapeDtypeStruct((1,), jnp.float32),
                   jax.ShapeDtypeStruct((1,), jnp.float32)),
        grid_spec=pltpu.PrefetchScalarGridSpec(
            num_scalar_prefetch=1,
            grid=(B, kt, P),
            in_specs=[
                # lower / upper / median quantile slices of the SAME pred
                # buffer, selected purely via index_map (no gather copies).
                pl.BlockSpec((None, None, tile_r, L),
                             lambda b, k, p, toa: (b, p, k, 0)),
                pl.BlockSpec((None, None, tile_r, L),
                             lambda b, k, p, toa: (b, Q - 1 - p, k, 0)),
                pl.BlockSpec((None, None, tile_r, L),
                             lambda b, k, p, toa: (b, mid, k, 0)),
                pl.BlockSpec((None, tile_r, L), lambda b, k, p, toa: (b, k, 0)),
                pl.BlockSpec((None, tile_r, L), lambda b, k, p, toa: (b, k, 0)),
            ],
            out_specs=(smem_out, smem_out, smem_out),
            scratch_shapes=[pltpu.VMEM((P, 1, L), jnp.float32),
                            pltpu.VMEM((1, L), jnp.float32),
                            pltpu.VMEM((1, L), jnp.float32)],
        ),
        compiler_params=pltpu.CompilerParams(
            dimension_semantics=("arbitrary", "arbitrary", "arbitrary")),
    )(toa_bp, pred4, pred4, pred4, true3, mask3)


# ----------------------------- IntervalScores port --------------------------

def interval_scores(pred, true, mask, quantiles, quantile_weights,
                    train_run=True, loss_type='quantile', is_median=None):
    """JAX/Pallas port of IntervalScores.forward.

    `is_median`: optional static tuple of bools (one per quantile) telling
    which quantiles equal 0.5 (skipped in the pinball sum, torch semantics).
    Passing it avoids a per-call host sync on `quantiles`.
    """
    pred = jnp.asarray(pred)            # f32 or bf16 kept as-is in HBM
    true = jnp.asarray(true)
    mask = jnp.asarray(mask)
    quantiles = jnp.asarray(quantiles, jnp.float32)

    B, Q = pred.shape[0], pred.shape[1]
    M = int(np.prod(pred.shape[2:]))
    if M % _LANES != 0:
        # TODO(synk): support per-sample volumes not divisible by 128 lanes.
        raise ValueError("T*C*H*W must be a multiple of 128 for the TPU kernel")
    R = M // _LANES
    n_elem = B * M
    mid = len(quantile_weights) // 2
    tile_r = _pick_tile_rows(R)

    # Free views of the original layout (no transpose / gather in HBM).
    pred4 = pred.reshape(B, Q, R, _LANES)
    true3 = true.reshape(B, R, _LANES)
    mask3 = mask.reshape(B, R, _LANES)

    if loss_type == 'quantile':
        if is_median is None:
            # TODO(synk): host-sync fallback; pass `is_median` statically.
            q_host = np.asarray(quantiles)
            is_median = tuple(bool(q_host[0, i] == 0.5) for i in range(Q))
        psum, asum = _quantile_sums(pred4, true3, mask3, quantiles, mid, tile_r)
        total = jnp.float32(0.0)
        individual = []
        for i, w in enumerate(quantile_weights):
            if is_median[i]:
                continue
            li = w * (psum[i] / n_elem)
            individual.append(li)
            total = total + li
        mae = asum[0] / n_elem
        individual.append(mae)
        total = total + mae
        return total, individual

    elif loss_type == 'mis':
        P = mid
        assert P >= 1, "MIS loss needs at least one (lower, upper) quantile pair"
        lo_idx = np.arange(P)
        up_idx = Q - 1 - lo_idx
        alpha = 1.0 - (quantiles[:, up_idx] - quantiles[:, lo_idx])     # [B, P]
        toa = (2.0 / alpha).astype(jnp.float32)
        msum, maesum, masksum = _mis_sums(pred4, true3, mask3, toa, mid, tile_r)
        mask_mean = masksum[0] / n_elem
        total = jnp.float32(0.0)
        individual = []
        for p in range(P):
            w = (quantile_weights[p] + quantile_weights[Q - 1 - p]) / 2.0
            li = w * (msum[p] / n_elem) * mask_mean
            individual.append(li)
            total = total + li
        mae = maesum[0] / n_elem
        individual.append(mae)
        total = total + mae
        return total, individual

    else:
        raise ValueError("Invalid loss_type. Choose 'quantile' or 'mis'.")


# ----------------------------- pure-JAX reference ---------------------------

def _reference(pred, true, mask, quantiles, quantile_weights, loss_type):
    pred = jnp.asarray(pred, jnp.float32)
    true = jnp.asarray(true, jnp.float32)
    mask = jnp.asarray(mask, jnp.float32)
    quantiles = jnp.asarray(quantiles, jnp.float32)
    pred_m = pred * mask[:, None]
    Q = pred.shape[1]
    mid = len(quantile_weights) // 2
    q_np = np.asarray(quantiles)
    total = jnp.float32(0.0)
    ind = []
    if loss_type == 'quantile':
        for i, w in enumerate(quantile_weights):
            if q_np[0, i] == 0.5:
                continue
            qp = pred_m[:, i]
            err = (qp - true) * mask
            qe = quantiles[:, i].reshape(-1, 1, 1, 1, 1)
            l = jnp.where(err < 0, qe * jnp.abs(err),
                          jnp.where(err > 0, (1 - qe) * jnp.abs(err), 0.0))
            li = w * jnp.mean(l)
            ind.append(li)
            total = total + li
        mae = jnp.mean(jnp.abs(pred_m[:, mid] - true))
        ind.append(mae)
        total = total + mae
    else:
        for i in range(mid):
            lo = pred_m[:, i]
            up = pred_m[:, Q - 1 - i]
            alpha = (1 - (quantiles[:, Q - 1 - i] - quantiles[:, i])).reshape(-1, 1, 1, 1, 1)
            l = up - lo
            l = jnp.maximum(l, l + 2.0 / alpha * (lo - true))
            l = jnp.maximum(l, l + 2.0 / alpha * (true - up))
            l = jnp.mean(l)
            l = jnp.mean(l * mask)
            w = (quantile_weights[i] + quantile_weights[Q - 1 - i]) / 2.0
            li = w * l
            ind.append(li)
            total = total + li
        mae = jnp.mean(jnp.abs(pred_m[:, mid] - true))
        ind.append(mae)
        total = total + mae
    return total, ind


# ----------------------------------- main -----------------------------------

if __name__ == "__main__":
    key = jax.random.PRNGKey(0)
    B, Q, T, C, H, W = 2, 3, 4, 2, 8, 8
    quantile_weights = [0.3, 0.4, 0.3]

    k1, k2, k3 = jax.random.split(key, 3)
    pred = jax.random.normal(k1, (B, Q, T, C, H, W), jnp.float32)
    true = jax.random.normal(k2, (B, T, C, H, W), jnp.float32)
    mask = (jax.random.uniform(k3, (B, T, C, H, W)) > 0.3).astype(jnp.float32)
    quantiles = jnp.tile(jnp.array([[0.1, 0.5, 0.9]], jnp.float32), (B, 1))
    is_median = (False, True, False)     # static; avoids host sync on quantiles

    for lt in ('quantile', 'mis'):
        total, individual = interval_scores(pred, true, mask, quantiles,
                                            quantile_weights, loss_type=lt,
                                            is_median=is_median)
        total = jax.block_until_ready(total)
        ref_total, ref_ind = _reference(pred, true, mask, quantiles,
                                        quantile_weights, lt)
        np.testing.assert_allclose(np.asarray(total), np.asarray(ref_total),
                                   rtol=2e-5, atol=1e-5)
        assert len(individual) == len(ref_ind)
        for a, b in zip(individual, ref_ind):
            np.testing.assert_allclose(np.asarray(a), np.asarray(b),
                                       rtol=2e-5, atol=1e-5)

    print("KERNEL_OK")
</pallas_src>

<mosaic_0001>
module attributes {stable_mosaic.version = 11 : i64} {
  func.func @_quantile_kernel(%arg0: i32, %arg1: i32, %arg2: i32, %arg3: memref<2x3xf32, #tpu.memory_space<smem>>, %arg4: memref<1x1x4x128xf32, #tpu.memory_space<vmem>>, %arg5: memref<1x4x128xf32, #tpu.memory_space<vmem>>, %arg6: memref<1x4x128xf32, #tpu.memory_space<vmem>>, %arg7: memref<3xf32, #tpu.memory_space<smem>>, %arg8: memref<1xf32, #tpu.memory_space<smem>>, %arg9: memref<3x1x128xf32, #tpu.memory_space<vmem>>, %arg10: memref<1x128xf32, #tpu.memory_space<vmem>>) attributes {dimension_semantics = [#tpu.dimension_semantics<arbitrary>, #tpu.dimension_semantics<arbitrary>, #tpu.dimension_semantics<arbitrary>], iteration_bounds = array<i64: 2, 1, 3>, scalar_prefetch = 1 : i64, scratch_operands = 2 : i64, tpu.core_type = #tpu.core_type<tc>, window_params = [{transform_indices = @transform_0, window_bounds = array<i64: 1, 1, 4, 128>}, {transform_indices = @transform_1, window_bounds = array<i64: 1, 4, 128>}, {transform_indices = @transform_2, window_bounds = array<i64: 1, 4, 128>}, {transform_indices = @transform_3, window_bounds = array<i64: 3>}, {transform_indices = @transform_4, window_bounds = array<i64: 1>}]} {
    %c0_i32 = arith.constant 0 : i32
    %0 = arith.cmpi eq, %arg0, %c0_i32 : i32
    %c0_i32_0 = arith.constant 0 : i32
    %1 = arith.cmpi eq, %arg1, %c0_i32_0 : i32
    %2 = arith.andi %0, %1 : i1
    %c1_i32 = arith.constant 1 : i32
    %3 = arith.cmpi eq, %arg0, %c1_i32 : i32
    %c0_i32_1 = arith.constant 0 : i32
    %4 = arith.cmpi eq, %arg1, %c0_i32_1 : i32
    %5 = arith.andi %3, %4 : i1
    %6 = arith.extui %2 : i1 to i32
    %c0_i32_2 = arith.constant 0 : i32
    %7 = arith.cmpi ne, %6, %c0_i32_2 : i32
    scf.if %7 {
      %cst_25 = arith.constant 0.000000e+00 : f32
      %51 = vector.broadcast %cst_25 : f32 to vector<1x128xf32>
      %52 = arith.index_cast %arg2 : i32 to index
      %c0_26 = arith.constant 0 : index
      %c0_27 = arith.constant 0 : index
      %53 = vector.load %arg9[%52, %c0_26, %c0_27] : memref<3x1x128xf32, #tpu.memory_space<vmem>>, vector<1x1x128xf32>
      %54 = vector.shape_cast %53 : vector<1x1x128xf32> to vector<1x128xf32>
      %55 = vector.shape_cast %51 : vector<1x128xf32> to vector<1x1x128xf32>
      tpu.vector_store %arg9[%52, %c0_26, %c0_27], %55 {strides = array<i32>} : memref<3x1x128xf32, #tpu.memory_space<vmem>>, vector<1x1x128xf32>,
    } else {
    }
    %c0_i32_3 = arith.constant 0 : i32
    %8 = arith.cmpi eq, %arg2, %c0_i32_3 : i32
    %9 = arith.andi %2, %8 : i1
    %10 = arith.extui %9 : i1 to i32
    %c0_i32_4 = arith.constant 0 : i32
    %11 = arith.cmpi ne, %10, %c0_i32_4 : i32
    scf.if %11 {
      %cst_25 = arith.constant 0.000000e+00 : f32
      %51 = vector.broadcast %cst_25 : f32 to vector<1x128xf32>
      %c0_26 = arith.constant 0 : index
      %c0_27 = arith.constant 0 : index
      %52 = vector.load %arg10[%c0_26, %c0_27] : memref<1x128xf32, #tpu.memory_space<vmem>>, vector<1x128xf32>
      tpu.vector_store %arg10[%c0_26, %c0_27], %51 {strides = array<i32>} : memref<1x128xf32, #tpu.memory_space<vmem>>, vector<1x128xf32>,
    } else {
    }
    %c0 = arith.constant 0 : index
    %c0_5 = arith.constant 0 : index
    %c0_6 = arith.constant 0 : index
    %12 = vector.load %arg6[%c0, %c0_5, %c0_6] : memref<1x4x128xf32, #tpu.memory_space<vmem>>, vector<1x4x128xf32>
    %13 = vector.shape_cast %12 : vector<1x4x128xf32> to vector<4x128xf32>
    %c0_7 = arith.constant 0 : index
    %c0_8 = arith.constant 0 : index
    %c0_9 = arith.constant 0 : index
    %14 = vector.load %arg5[%c0_7, %c0_8, %c0_9] : memref<1x4x128xf32, #tpu.memory_space<vmem>>, vector<1x4x128xf32>
    %15 = vector.shape_cast %14 : vector<1x4x128xf32> to vector<4x128xf32>
    %c0_10 = arith.constant 0 : index
    %c0_11 = arith.constant 0 : index
    %c0_12 = arith.constant 0 : index
    %c0_13 = arith.constant 0 : index
    %16 = vector.load %arg4[%c0_10, %c0_11, %c0_12, %c0_13] : memref<1x1x4x128xf32, #tpu.memory_space<vmem>>, vector<1x1x4x128xf32>
    %17 = vector.shape_cast %16 : vector<1x1x4x128xf32> to vector<4x128xf32>
    %18 = arith.mulf %17, %13 : vector<4x128xf32>
    %19 = arith.subf %18, %15 : vector<4x128xf32>
    %20 = arith.mulf %19, %13 : vector<4x128xf32>
    %21 = math.absf %20 : vector<4x128xf32>
    %22 = arith.index_cast %arg0 : i32 to index
    %23 = arith.index_cast %arg2 : i32 to index
    %24 = memref.load %arg3[%22, %23] : memref<2x3xf32, #tpu.memory_space<smem>>
    %cst = arith.constant 0.000000e+00 : f32
    %25 = vector.broadcast %cst : f32 to vector<4x128xf32>
    %26 = arith.cmpf olt, %20, %25 : vector<4x128xf32>
    %cst_14 = arith.constant 1.000000e+00 : f32
    %27 = arith.subf %cst_14, %24 : f32
    %28 = vector.broadcast %24 : f32 to vector<4x128xf32>
    %29 = vector.broadcast %27 : f32 to vector<4x128xf32>
    %30 = arith.select %26, %28, %29 : vector<4x128xi1>, vector<4x128xf32>
    %31 = arith.mulf %30, %21 : vector<4x128xf32>
    %32 = arith.index_cast %arg2 : i32 to index
    %c0_15 = arith.constant 0 : index
    %c0_16 = arith.constant 0 : index
    %33 = vector.load %arg9[%32, %c0_15, %c0_16] : memref<3x1x128xf32, #tpu.memory_space<vmem>>, vector<1x1x128xf32>
    %34 = vector.shape_cast %33 : vector<1x1x128xf32> to vector<1x128xf32>
    %cst_17 = arith.constant dense<0.000000e+00> : vector<128xf32>
    %35 = vector.multi_reduction <add>, %31, %cst_17 [0] : vector<4x128xf32> to vector<128xf32>
    %36 = vector.shape_cast %35 : vector<128xf32> to vector<1x128xf32>
    %37 = arith.addf %34, %36 : vector<1x128xf32>
    %38 = arith.index_cast %arg2 : i32 to index
    %c0_18 = arith.constant 0 : index
    %c0_19 = arith.constant 0 : index
    %39 = vector.load %arg9[%38, %c0_18, %c0_19] : memref<3x1x128xf32, #tpu.memory_space<vmem>>, vector<1x1x128xf32>
    %40 = vector.shape_cast %39 : vector<1x1x128xf32> to vector<1x128xf32>
    %41 = vector.shape_cast %37 : vector<1x128xf32> to vector<1x1x128xf32>
    tpu.vector_store %arg9[%38, %c0_18, %c0_19], %41 {strides = array<i32>} : memref<3x1x128xf32, #tpu.memory_space<vmem>>, vector<1x1x128xf32>,
    %c1_i32_20 = arith.constant 1 : i32
    %42 = arith.cmpi eq, %arg2, %c1_i32_20 : i32
    %43 = arith.extui %42 : i1 to i32
    %c0_i32_21 = arith.constant 0 : i32
    %44 = arith.cmpi ne, %43, %c0_i32_21 : i32
    scf.if %44 {
      %c0_25 = arith.constant 0 : index
      %c0_26 = arith.constant 0 : index
      %51 = vector.load %arg10[%c0_25, %c0_26] : memref<1x128xf32, #tpu.memory_space<vmem>>, vector<1x128xf32>
      %52 = arith.subf %18, %15 : vector<4x128xf32>
      %53 = math.absf %52 : vector<4x128xf32>
      %cst_27 = arith.constant dense<0.000000e+00> : vector<128xf32>
      %54 = vector.multi_reduction <add>, %53, %cst_27 [0] : vector<4x128xf32> to vector<128xf32>
      %55 = vector.shape_cast %54 : vector<128xf32> to vector<1x128xf32>
      %56 = arith.addf %51, %55 : vector<1x128xf32>
      %c0_28 = arith.constant 0 : index
      %c0_29 = arith.constant 0 : index
      %57 = vector.load %arg10[%c0_28, %c0_29] : memref<1x128xf32, #tpu.memory_space<vmem>>, vector<1x128xf32>
      tpu.vector_store %arg10[%c0_28, %c0_29], %56 {strides = array<i32>} : memref<1x128xf32, #tpu.memory_space<vmem>>, vector<1x128xf32>,
    } else {
    }
    %45 = arith.extui %5 : i1 to i32
    %c0_i32_22 = arith.constant 0 : i32
    %46 = arith.cmpi ne, %45, %c0_i32_22 : i32
    scf.if %46 {
      %51 = arith.index_cast %arg2 : i32 to index
      %c0_25 = arith.constant 0 : index
      %c0_26 = arith.constant 0 : index
      %52 = vector.load %arg9[%51, %c0_25, %c0_26] : memref<3x1x128xf32, #tpu.memory_space<vmem>>, vector<1x1x128xf32>
      %53 = vector.shape_cast %52 : vector<1x1x128xf32> to vector<1x128xf32>
      %54 = vector.shape_cast %53 : vector<1x128xf32> to vector<1x1x128xf32>
      %cst_27 = arith.constant dense<0.000000e+00> : vector<1xf32>
      %55 = vector.multi_reduction <add>, %54, %cst_27 [1, 2] : vector<1x1x128xf32> to vector<1xf32>
      %56 = vector.shape_cast %55 : vector<1xf32> to vector<1x1x1xf32>
      %57 = vector.extract %56[0, 0, 0] : f32 from vector<1x1x1xf32>
      %58 = arith.index_cast %arg2 : i32 to index
      %59 = memref.load %arg7[%58] : memref<3xf32, #tpu.memory_space<smem>>
      memref.store %57, %arg7[%58] : memref<3xf32, #tpu.memory_space<smem>>
    } else {
    }
    %c1_i32_23 = arith.constant 1 : i32
    %47 = arith.cmpi eq, %arg2, %c1_i32_23 : i32
    %48 = arith.andi %5, %47 : i1
    %49 = arith.extui %48 : i1 to i32
    %c0_i32_24 = arith.constant 0 : i32
    %50 = arith.cmpi ne, %49, %c0_i32_24 : i32
    scf.if %50 {
      %c0_25 = arith.constant 0 : index
      %c0_26 = arith.constant 0 : index
      %51 = vector.load %arg10[%c0_25, %c0_26] : memref<1x128xf32, #tpu.memory_space<vmem>>, vector<1x128xf32>
      %52 = vector.shape_cast %51 : vector<1x128xf32> to vector<1x1x128xf32>
      %cst_27 = arith.constant dense<0.000000e+00> : vector<1xf32>
      %53 = vector.multi_reduction <add>, %52, %cst_27 [1, 2] : vector<1x1x128xf32> to vector<1xf32>
      %54 = vector.shape_cast %53 : vector<1xf32> to vector<1x1x1xf32>
      %55 = vector.extract %54[0, 0, 0] : f32 from vector<1x1x1xf32>
      %c0_28 = arith.constant 0 : index
      %56 = memref.load %arg8[%c0_28] : memref<1xf32, #tpu.memory_space<smem>>
      memref.store %55, %arg8[%c0_28] : memref<1xf32, #tpu.memory_space<smem>>
    } else {
    }
    return
  }
  func.func @transform_0(%arg0: i32, %arg1: i32, %arg2: i32, %arg3: memref<2x3xf32, #tpu.memory_space<smem>>) -> (i32, i32, i32, i32) {
    %c0_i32 = arith.constant 0 : i32
    %c0_i32_0 = arith.constant 0 : i32
    return %arg0, %arg2, %arg1, %c0_i32 : i32, i32, i32, i32
  }
  func.func @transform_1(%arg0: i32, %arg1: i32, %arg2: i32, %arg3: memref<2x3xf32, #tpu.memory_space<smem>>) -> (i32, i32, i32) {
    %c0_i32 = arith.constant 0 : i32
    %c0_i32_0 = arith.constant 0 : i32
    return %arg0, %arg1, %c0_i32 : i32, i32, i32
  }
  func.func @transform_2(%arg0: i32, %arg1: i32, %arg2: i32, %arg3: memref<2x3xf32, #tpu.memory_space<smem>>) -> (i32, i32, i32) {
    %c0_i32 = arith.constant 0 : i32
    %c0_i32_0 = arith.constant 0 : i32
    return %arg0, %arg1, %c0_i32 : i32, i32, i32
  }
  func.func @transform_3(%arg0: i32, %arg1: i32, %arg2: i32, %arg3: memref<2x3xf32, #tpu.memory_space<smem>>) -> i32 {
    %c0_i32 = arith.constant 0 : i32
    %c0_i32_0 = arith.constant 0 : i32
    return %c0_i32 : i32
  }
  func.func @transform_4(%arg0: i32, %arg1: i32, %arg2: i32, %arg3: memref<2x3xf32, #tpu.memory_space<smem>>) -> i32 {
    %c0_i32 = arith.constant 0 : i32
    %c0_i32_0 = arith.constant 0 : i32
    return %c0_i32 : i32
  }
}

</mosaic_0001>

<bundles_post_ra>
// kernel: tpu_custom_call.1
= control target key start
LH: loop header
LB: loop body
LE: loop exit
PB: predicated region body
PF: predicated region fallthrough
CT: control target
= control target key end

     0   :  { %s919_s18 = smov [#allocation5]   ;;  %s1213_s0 = inlined_call_operand.hbm [shape: f32[2,3], index: 0, kind: input, shape index: {}]   ;;  %s1214_s1 = inlined_call_operand.hbm [shape: f32[2,3,4,128], index: 1, kind: input, shape index: {}]   ;;  %s1215_s2 = inlined_call_operand.hbm [shape: f32[2,4,128], index: 2, kind: input, shape index: {}]   ;;  %s1216_s3 = inlined_call_operand.hbm [shape: f32[2,4,128], index: 3, kind: input, shape index: {}]   ;;  %s1217_s4 = inlined_call_operand.hbm [shape: f32[3], index: 4, kind: output, shape index: {0}]   ;;  %s1218_s5 = inlined_call_operand.hbm [shape: f32[1], index: 5, kind: output, shape index: {1}]  }
   0x1   :  { %1230 = sst [smem:[#allocation27_spill]] %s1215_s2 }
   0x2   :  { %1231 = sst [smem:[#allocation28_spill]] %s1217_s4 }
   0x3   :  { %1232 = sst [smem:[#allocation29_spill]] %s1218_s5 }
   0x4   :  { %12 = dma.hbm_to_smem %s1213_s0, 32, %s919_s18, [#allocation4] }
   0x5   :  { %857 = dma.done.wait [#allocation4], 32 }
   0x6   :  { %858 = vsyncadd [#allocation4], 4294967264 }
   0x7   :  { %14 = sfence }
   0x8   :  { %15 = vsyncpa [#allocation7], 0 }
   0x9   :  { %17 = vsyncpa [#allocation7 + $0x1], 0 }
   0xa   :  { %18 = vsyncpa [#allocation10], 0 }
   0xb   :  { %20 = vsyncpa [#allocation10 + $0x1], 0 }
   0xc   :  { %21 = vsyncpa [#allocation8], 0 }
   0xd   :  { %22 = vsyncpa [#allocation14], 0  ;;  %s960_s21 = smov 0   ;;  %s962_s22 = smov 0  }
   0xe   :  { %s964_s23 = smov 0   ;;  %s966_s24 = smov 0  }
   0xf   :  { %s968_s25 = smov 0   ;;  %s970_s0 = smov 0  }
  0x10   :  { %s972_s26 = smov 0   ;;  %s974_s27 = smov 0  }
  0x11   :  { %s976_s28 = smov 0   ;;  %s978_s29 = smov 0  }
  0x12   :  { %s980_s30 = smov 0  }
  0x13 LB: > { %1233 = sst [smem:[#allocation20_spill]] %s881_s22  ;;  %s1014_s6 = sadd.s32 4294967295, %s917_s30   ;;  %s917_s30 = sphi %s980_s30, %s28_s30   ;;  %s913_s29 = sphi %s978_s29, %s1276_s29   ;;  %s909_s28 = sphi %s976_s28, %s1275_s28   ;;  %s905_s27 = sphi %s974_s27, %s1274_s27   ;;  %s901_s26 = sphi %s972_s26, %s1273_s26   ;;  %s897_s0 = sphi %s970_s0, %s1272_s0   ;;  %s893_s25 = sphi %s968_s25, %s1271_s25   ;;  %s889_s24 = sphi %s966_s24, %s1270_s24   ;;  %s885_s23 = sphi %s964_s23, %s1269_s23   ;;  %s881_s22 = sphi %s962_s22, %s1268_s22   ;;  %s877_s21 = sphi %s960_s21, %s1266_s21  }
  0x14   : > { %1234 = sst [smem:[#allocation21_spill]] %s901_s26  ;;  %p66_p0 = scmp.eq.s32.totalorder %s917_s30, 0 }
  0x15   : > { %1235 = sst [smem:[#allocation22_spill]] %s905_s27  ;;  %p72_p1 = scmp.eq.s32.totalorder %s1014_s6, 0 }
  0x16   : > { %1236 = sst [smem:[#allocation23_spill]] %s1014_s6  ;;  %p93_p2 = scmp.ne.s32.totalorder %s885_s23, %s881_s22 }
  0x17   : > { %p99_p3 = scmp.ne.s32.totalorder %s881_s22, %s877_s21  ;;  %p603_p4 = scmp.lt.s32.totalorder %s917_s30, 6 }
  0x18   : > { %p95_p5 = por %p93_p2, %p66_p0  ;;  %s214_s8 = sand.u32 1, %s917_s30  }
  0x19   : > { %p1026_p6 = por %p99_p3, %p72_p1  ;;  %s216_s9 = sand.u32 1, %s885_s23  }
  0x1a   : > { %s1032_s10 = sshll.u32 %s216_s9, 2  ;;  %s1219_s11 = sshll.u32 %s913_s29, 6 }
  0x1b   : > { %s1237_s7 = scalar_select %p1026_p6, 1, 0 }
  0x1c   : > { %s1239_s2 = sld [smem:[#allocation27_spill]]  ;;  %s218_s15 = scalar_lea.vmem [#allocation9], %s1032_s10 }
  0x1d   : > { %1238 = sst [smem:[#allocation24_spill]] %s1237_s7  ;;  %s226_s16 = sshll.u32 %s218_s15, 4  ;;  %s227_s16 = int_to_ptr.vmem [resolvable:$true] %s226_s16 }
  0x1e   : > { %p1043_p7 = pnand %p603_p4, %p95_p5  ;;  %p558_p8 = scmp.ge.s32.totalorder %s917_s30, 1 }
  0x1f   : > { %s1049_s19 = scalar_lea.sflag [#allocation10], %s214_s8  ;;  %s722_s20 = scalar_lea.vmem %s227_s16, 64 }
  0x20   : > { %p1229_p9 = pneg %p1043_p7  ;;  %p723_p10 = scmp.ne.s32.totalorder %s227_s16, %s722_s20 }
  0x21   : > { %s920_s21 = smov [#allocation9]  }
  0x22   : > { %s224_s14 = scalar_lea.hbm %s1239_s2, %s1219_s11  ;;  %p725_p11 = pnand %p723_p10, %p1229_p9 }
  0x23   : > { %s727_s9 = sshll.u32 %s920_s21, 4  ;;  %s728_s9 = int_to_ptr.vmem [resolvable:$false] %s727_s9 }
  0x24   : > { %p726_p12 = pneg %p725_p11  ;;  %s729_s12 = scalar_lea.vmem %s728_s9, 128 }
  0x25   : > { %p730_p13 = scmp.lt.s32.totalorder %s227_s16, %s728_s9  ;;  %p731_p2 = scmp.lt.s32.totalorder %s729_s12, %s722_s20 }
  0x27   : > { %p732_p3 = por %p731_p2, %p730_p13 }
  0x29   : > { %p733_p5 = pnand %p732_p3, %p726_p12 }
  0x2b   : > { %736 = shalt.err (!%p733_p5)
}
  0x2c   : > { %599 = dma.hbm_to_vmem [thread:$0]  (!%p1043_p7), %s224_s14, 64, %s227_s16, %s1049_s19  }
  0x2d   : > { %p250_p10 = scmp.lt.s32.totalorder %s917_s30, 7  ;;  %s40_s13 = sadd.s32 1, %s909_s28 }
  0x2e   : > { %s47_s15 = sadd.s32 1, %s913_s29  ;;  %p41_p12 = scmp.ge.s32.totalorder %s40_s13, 3 }
  0x2f   : > { %p1062_p11 = pnand %p558_p8, %p250_p10  ;;  %s58_s20 = sadd.s32 1, %s897_s0 }
  0x30   : > { %p65_p13 = scmp.ne.s32.totalorder %s897_s0, %s893_s25  ;;  %p71_p2 = scmp.ne.s32.totalorder %s893_s25, %s889_s24 }
  0x31   : > { %s1278_s13 = smov (%p41_p12, %s40_s13), 0  ;;  %s1280_s15 = smov (!%p41_p12, %s47_s15), %s913_s29 }
  0x32   : > { %1242 = sst [smem:[#allocation25_spill]] %s1278_s13  ;;  %s52_s14 = ssub.s32 %s909_s28, %s1278_s13 }
  0x33   : > { %p1080_p8 = por %p66_p0, %p65_p13  ;;  %p49_p3 = scmp.ge.s32.totalorder %s1280_s15, 2 }
  0x34   : > { %p1086_p5 = por %p72_p1, %p71_p2  ;;  %s193_s24 = sand.u32 1, %s897_s0  }
  0x35   : > { %s574_s9 = smul.u32 3, %s913_s29  ;;  %s1282_s15 = smov (%p49_p3, %s1280_s15), 0 }
  0x36   : > { %s1244_s21 = scalar_select %p1086_p5, 1, 0 }
  0x37   : > { %s552_s12 = sshll.u32 %s193_s24, 2  ;;  %s51_s11 = ssub.s32 %s913_s29, %s1282_s15 }
  0x38   : > { %1245 = sst [smem:[#allocation26_spill]] %s1244_s21  ;;  %s53_s18 = sor.u32 %s52_s14, %s51_s11 }
  0x39   : > { %p84_p0 = scmp.eq.s32.totalorder %s51_s11, 0  ;;  %p56_p10 = scmp.eq.s32.totalorder %s53_s18, 0 }
  0x3a   : > { %s203_s2 = sadd.s32 %s909_s28, %s574_s9  ;;  %s1246_s13 = sadd.s32 1, %s885_s23 }
  0x3b   : > { %s1100_s5 = scalar_select %p84_p0, %s885_s23, %s1246_s13  }
  0x3c   : > { %s1103_s4 = scalar_select %p56_p10, %s897_s0, %s58_s20  }
  0x3d   : > { %s553_s26 = sshll.u32 %s203_s2, 6  ;;  %s197_s27 = scalar_lea.vmem [#allocation6], %s552_s12 }
  0x3e   : > { %s207_s7 = sshll.u32 %s197_s27, 4  ;;  %s205_s21 = scalar_lea.hbm %s1214_s1, %s553_s26  ;;  %s208_s7 = int_to_ptr.vmem [resolvable:$true] %s207_s7 }
  0x3f   : > { %p1112_p1 = pnand %p603_p4, %p1080_p8  ;;  %s237_s11 = scalar_lea.vmem [#allocation11], %s1032_s10 }
  0x40   : > { %s245_s18 = sshll.u32 %s237_s11, 4  ;;  %s1248_s13 = sshll.u32 %s913_s29, 6  ;;  %s1124_s18 = int_to_ptr.vmem [resolvable:$true] %s245_s18 }
  0x41   : > { %s1122_s2 = scalar_lea.hbm %s1216_s3, %s1248_s13  ;;  %s194_s22 = scalar_lea.sflag [#allocation7], %s193_s24 }
  0x42   : > { %p739_p12 = pneg %p1112_p1  ;;  %s750_s26 = scalar_lea.vmem %s208_s7, 64 }
  0x43   : > { %p751_p13 = scmp.ne.s32.totalorder %s208_s7, %s750_s26  ;;  %s921_s27 = smov [#allocation6]  }
  0x44   : > { %s755_s6 = sshll.u32 %s921_s27, 4  ;;  %s756_s6 = int_to_ptr.vmem [resolvable:$false] %s755_s6 }
  0x45   : > { %p753_p4 = pnand %p751_p13, %p739_p12  ;;  %s757_s10 = scalar_lea.vmem %s756_s6, 128 }
  0x46   : > { %p758_p8 = scmp.lt.s32.totalorder %s208_s7, %s756_s6  ;;  %p759_p3 = scmp.lt.s32.totalorder %s757_s10, %s750_s26 }
  0x47   : > { %p754_p2 = pneg %p753_p4 }
  0x48   : > { %p760_p0 = por %p759_p3, %p758_p8 }
  0x4a   : > { %p761_p10 = pnand %p760_p0, %p754_p2 }
  0x4c   : > { %764 = shalt.err (!%p761_p10)
}
  0x4d   : > { %596 = dma.hbm_to_vmem [thread:$0]  (!%p1112_p1), %s205_s21, 64, %s208_s7, %s194_s22  }
  0x4e   : > { %s778_s16 = scalar_lea.vmem %s1124_s18, 64  ;;  %p1249_p12 = pneg %p1043_p7 }
  0x4f   : > { %p779_p9 = scmp.ne.s32.totalorder %s1124_s18, %s778_s16  ;;  %s922_s24 = smov [#allocation11]  }
  0x50   : > { %s783_s12 = sshll.u32 %s922_s24, 4  ;;  %s784_s12 = int_to_ptr.vmem [resolvable:$false] %s783_s12 }
  0x51   : > { %p781_p13 = pnand %p779_p9, %p1249_p12  ;;  %s785_s11 = scalar_lea.vmem %s784_s12, 128 }
  0x52   : > { %p786_p8 = scmp.lt.s32.totalorder %s1124_s18, %s784_s12  ;;  %p787_p2 = scmp.lt.s32.totalorder %s785_s11, %s778_s16 }
  0x53   : > { %p782_p4 = pneg %p781_p13 }
  0x54   : > { %p788_p3 = por %p787_p2, %p786_p8 }
  0x56   : > { %p789_p0 = pnand %p788_p3, %p782_p4 }
  0x58   : > { %792 = shalt.err (!%p789_p0)
}
  0x59   : > { %602 = dma.hbm_to_vmem [thread:$0]  (!%p1043_p7), %s1122_s2, 64, %s1124_s18, %s1049_s19  }
  0x5a   : > { %254 = sbr.rel (%p1062_p11) target bundleno = 629 (0x275), region = 32  ;;  %s256_s21 = sand.u32 (!%p1062_p11), 1, %s893_s25  }
  0x5b   : > { %s559_s14 = sshll.u32 (!%p1062_p11), %s256_s21, 2  ;;  %s257_s13 = scalar_lea.sflag (!%p1062_p11), [#allocation7], %s256_s21 }
  0x5c   : > { %s260_s20 = scalar_lea.vmem (!%p1062_p11), [#allocation6], %s559_s14 }
  0x5f   : > { %860 = dma.done.wait (%p1086_p5), %s257_s13, 64  }
  0x60   : > { %862 = vsyncadd (%p1086_p5), %s257_s13, 4294967232  ;;  %s1251_s9 = sld [smem:[#allocation23_spill]] }
  0x61   : > { %s1252_s17 = sld [smem:[#allocation20_spill]] }
  0x66   : > { %s265_s26 = sand.u32 1, %s1251_s9  }
  0x67   : > { %s267_s27 = sand.u32 1, %s1252_s17   ;;  %s266_s18 = scalar_lea.sflag [#allocation10], %s265_s26 }
  0x68   : > { %s560_s19 = sshll.u32 %s267_s27, 2 }
  0x69   : > { %s269_s8 = scalar_lea.vmem [#allocation9], %s560_s19 }
  0x6a   : > { %864 = dma.done.wait (%p1026_p6), %s266_s18, 128  }
  0x6b   : > { %866 = vsyncadd (%p1026_p6), %s266_s18, 4294967168  ;;  %s1254_s2 = sld [smem:[#allocation22_spill]]  ;;  %s278_s6 = scalar_lea.vmem [#allocation11], %s560_s19 }
  0x71   : > { %p308_p7 = scmp.eq.s32.totalorder %s1254_s2, 0  ;;  %p312_p9 = scmp.eq.s32.totalorder %s1254_s2, 1 }
  0x72   : > { %s1255_s10 = sld [smem:[#allocation21_spill]] (%p308_p7)  ;;  %v923_v0 = vmov (%p308_p7), 0.0  }
  0x73   : > { %316 = sbr.rel (!%p308_p7) target bundleno = 122 (0x7a), region = 48 }
  0x78   : > { %s317_s16 = scalar_lea.vmem [#allocation2], %s1255_s10 }
  0x79   : > { %318 = vst [vmem:[%s317_s16] sm:$0x1] %v923_v0 }
  0x7a PF: > { %s1256_s24 = sld [smem:[#allocation21_spill]] }
  0x80   : > { %p319_p11 = scmp.eq.s32.totalorder %s1256_s24, 0 }
  0x82   : > { %p320_p5 = pnand %p319_p11, %p308_p7 }
  0x84   : > { %323 = sbr.rel (%p320_p5) target bundleno = 139 (0x8b), region = 52 }
  0x89   : > { %v924_v1 = vmov 0.0  }
  0x8a   : > { %324 = vst [vmem:[#allocation3] sm:$0x1] %v924_v1 }
  0x8b PF: > { %v325_v2 = vld [vmem:[%s278_s6] sm:$0xf]  ;;  %s1257_s12 = sld [smem:[#allocation21_spill]]  ;;  %v326_v3 = vld [vmem:[%s269_s8] sm:$0xf]  ;;  %vm348_vm1 = vcmask 1043456  }
  0x8c   : > { %s1258_s11 = sld [smem:[#allocation22_spill]]  ;;  %v327_v4 = vld [vmem:[%s260_s20] sm:$0xf] }
  0x8d   : > { %v328_v5 = vmul.f32 %v327_v4, %v325_v2 }
  0x8f   : > { %v329_v6 = vsub.f32 %v328_v5, %v326_v3 }
  0x91   : > { %s332_s7 = sshra.s32 %s1257_s12, 7  ;;  %s337_s21 = sand.u32 127, %s1257_s12  ;;  %v330_v7 = vmul.f32 %v329_v6, %v325_v2 }
  0x92   : > { %s334_s14 = sadd.s32 %s1258_s11, %s332_s7  ;;  %p358_p6 = scmp.eq.s32.totalorder %s1257_s12, 1 }
  0x93   : > { %s564_s13 = sshll.u32 %s334_s14, 7  ;;  %v331_v8 = vand.u32 2147483647, %v330_v7  ;;  %vm340_vm0 = vcmp.lt.f32.partialorder %v330_v7, 0.0  ;;  %s346_s20 = scalar_lea.vmem [#allocation2], %s1257_s12 }
  0x94   : > { %s338_s9 = sadd.s32 %s564_s13, %s337_s21  ;;  %v347_v19 = vld [vmem:[%s346_s20] sm:$0x1]  ;;  %p565_p1 = scmp.ne.s32.totalorder %s1257_s12, 1 }
  0x95   : > { %s339_s17 = sld [smem:[#allocation5 + %s338_s9]] }
  0x9b   : > { %s341_s22 = ssub.f32 1.0, %s339_s17  ;;  %v342_v9 = vstv %s339_s17 }
  0x9d   : > { %v343_v10 = vstv %s341_s22 }
  0x9e   : > { %v344_v11 = vsel %vm340_vm0, %v342_v9, %v343_v10 }
  0x9f   : > { %v345_v12 = vmul.f32 %v344_v11, %v331_v8 }
  0xa1   : > { %v349_v13 = vsel %vm348_vm1, %v345_v12, 0.0 }
  0xa2   : > { %v350_v14 = vrot.slane %v349_v13, 4 }
  0xa4   : > { %v351_v15 = vadd.f32 %v350_v14, %v349_v13 }
  0xa6   : > { %v352_v16 = vrot.slane %v351_v15, 2 }
  0xa8   : > { %v353_v17 = vadd.f32 %v352_v16, %v351_v15 }
  0xaa   : > { %v354_v18 = vrot.slane %v353_v17, 1 }
  0xac   : > { %v355_v20 = vadd.f32 %v354_v18, %v353_v17  ;;  %361 = sbr.rel (%p565_p1) target bundleno = 195 (0xc3), region = 56 }
  0xae   : > { %v356_v21 = vadd.f32 %v355_v20, %v347_v19 }
  0xb0   : > { %357 = vst [vmem:[%s346_s20] sm:$0x1] %v356_v21 }
  0xb1   : > { %v363_v22 = vand.u32 2147483647, %v329_v6  ;;  %v362_v29 = vld [vmem:[#allocation3] sm:$0x1] }
  0xb3   : > { %v364_v23 = vsel %vm348_vm1, %v363_v22, 0.0 }
  0xb4   : > { %v365_v24 = vrot.slane %v364_v23, 4 }
  0xb6   : > { %v366_v25 = vadd.f32 %v365_v24, %v364_v23 }
  0xb8   : > { %v367_v26 = vrot.slane %v366_v25, 2 }
  0xba   : > { %v368_v27 = vadd.f32 %v367_v26, %v366_v25 }
  0xbc   : > { %v369_v28 = vrot.slane %v368_v27, 1 }
  0xbe   : > { %v370_v30 = vadd.f32 %v369_v28, %v368_v27 }
  0xc0   : > { %v371_v31 = vadd.f32 %v370_v30, %v362_v29 }
  0xc2   : > { %372 = vst [vmem:[#allocation3] sm:$0x1] %v371_v31 }
  0xc3 PF: > { %374 = sbr.rel (!%p312_p9) target bundleno = 404 (0x194), region = 60  ;;  %s1260_s27 = sld [smem:[#allocation21_spill]] (%p312_p9)  ;;  %vm376_vm2 = vcmask (%p312_p9), 1040384  }
  0xc9   : > { %v375_v32 = vld [vmem:[%s346_s20] sm:$0x1]  ;;  %s387_s18 = scalar_lea.smem [#allocation12], %s1260_s27 }
  0xca   : > { %v377_v33 = vsel %vm376_vm2, %v375_v32, 0.0 }
  0xcb   : > { %378 = vadd.xlane.f32.xlu0 %v377_v33 }
 0x154   : > { %v379_v34 = vpop.xlane.xlu0 %378 }
 0x155   : > { %v380_v35 = vrot.slane %v379_v34, 4 }
 0x157   : > { %v381_v36 = vadd.f32 %v380_v35, %v379_v34 }
 0x159   : > { %v382_v37 = vrot.slane %v381_v36, 2 }
 0x15b   : > { %v383_v38 = vadd.f32 %v382_v37, %v381_v36 }
 0x15d   : > { %v384_v39 = vrot.slane %v383_v38, 1 }
 0x15f   : > { %v385_v40 = vadd.f32 %v384_v39, %v383_v38 }
 0x161   : > { %575 = vpush %v385_v40 }
 0x192   : > { %s576_s19 = spop %575 }
 0x193   : > { %388 = sst [smem:[%s387_s18]] %s576_s19 }
 0x194 PF: > { %p389_p10 = pnand %p358_p6, %p312_p9 }
 0x196   : > { %392 = sbr.rel (%p389_p10) target bundleno = 614 (0x266), region = 64 }
 0x19b   : > { %v393_v41 = vld [vmem:[#allocation3] sm:$0x1]  ;;  %vm394_vm3 = vcmask 1040384  }
 0x19c   : > { %v395_v42 = vsel %vm394_vm3, %v393_v41, 0.0 }
 0x19d   : > { %396 = vadd.xlane.f32.xlu0 %v395_v42 }
 0x226   : > { %v397_v43 = vpop.xlane.xlu0 %396 }
 0x227   : > { %v398_v44 = vrot.slane %v397_v43, 4 }
 0x229   : > { %v399_v45 = vadd.f32 %v398_v44, %v397_v43 }
 0x22b   : > { %v400_v46 = vrot.slane %v399_v45, 2 }
 0x22d   : > { %v401_v47 = vadd.f32 %v400_v46, %v399_v45 }
 0x22f   : > { %v402_v48 = vrot.slane %v401_v47, 1 }
 0x231   : > { %v403_v49 = vadd.f32 %v402_v48, %v401_v47 }
 0x233   : > { %577 = vpush %v403_v49 }
 0x264   : > { %s578_s6 = spop %577 }
 0x265   : > { %406 = sst [smem:[#allocation13]] %s578_s6 }
 0x266 PF: > { %s1263_s10 = sld [smem:[#allocation23_spill]]  ;;  %s925_s16 = smov [#allocation12]  }
 0x267   : > { %s1264_s11 = sld [smem:[#allocation28_spill]]  ;;  %s926_s7 = smov [#allocation13]  }
 0x268   : > { %s1265_s13 = sld [smem:[#allocation29_spill]] }
 0x26c   : > { %p604_p12 = scmp.eq.s32.totalorder %s1263_s10, 5 }
 0x26e   : > { %586 = dma.smem_to_hbm (%p604_p12), %s925_s16, 16, %s1264_s11, [#allocation8]  }
 0x26f   : > { %588 = dma.smem_to_hbm (%p604_p12), %s926_s7, 16, %s1265_s13, [#allocation14]  }
 0x270   : > { %868 = dma.done.wait (%p604_p12), [#allocation8], 16  }
 0x271   : > { %870 = vsyncadd (%p604_p12), [#allocation8], 4294967280 }
 0x272   : > { %872 = dma.done.wait (%p604_p12), [#allocation14], 16  }
 0x273   : > { %874 = vsyncadd (%p604_p12), [#allocation14], 4294967280 }
 0x274   : > { %433 = sfence }
 0x275 PF: > { %s28_s30 = sadd.s32 1, %s917_s30   ;;  %s1266_s21 = sld [smem:[#allocation20_spill]] }
 0x276   : > { %p25_p13 = scmp.ge.s32.totalorder %s28_s30, 8   ;;  %s1267_s9 = sld [smem:[#allocation25_spill]] }
 0x277   : > { %s1268_s22 = smov %s885_s23  ;;  %s1269_s23 = smov %s1100_s5 }
 0x278   : > { %s1270_s24 = smov %s893_s25  ;;  %s1271_s25 = smov %s897_s0 }
 0x279   : > { %s1272_s0 = smov %s1103_s4  ;;  %s1273_s26 = smov %s909_s28 }
 0x27a   : > { %s1274_s27 = smov %s913_s29  ;;  %s1276_s29 = smov %s1282_s15 }
 0x27b   :  { %27 = sbr.rel (!%p25_p13) target bundleno = 19 (0x13), region = 125 }
 0x27c   : > { %s1275_s28 = smov %s1267_s9 }
 0x280   :  { %439 = vsyncpa [#allocation7], 1 }
 0x281   :  { %441 = vsyncpa [#allocation7 + $0x1], 1 }
 0x282   :  { %442 = vsyncpa [#allocation10], 1 }
 0x283   :  { %444 = vsyncpa [#allocation10 + $0x1], 1 }
 0x284   :  { %445 = vsyncpa [#allocation8], 1 }
 0x285   :  { %447 = vsyncpa [#allocation8 + $0x1], 1 }
 0x286   :  { %448 = vsyncpa [#allocation14], 1 }

</bundles_post_ra>
